<compile_context>
chip_gen: v7x
topology: tpu7x:2x2x1
jax: 0.10.0
libtpu: 0.0.40
codegen_flags: <defaults>
</compile_context>

<pallas_src>
import jax
import jax.numpy as jnp
from jax.experimental import pallas as pl
from jax.experimental.pallas import tpu as pltpu

_LANE = 128


def _adaptive_pool_matrix(in_size: int, out_size: int) -> jnp.ndarray:
    """Row-stochastic P (out, in) with P @ v == adaptive_avg_pool1d(v) (PyTorch bins)."""
    i = jnp.arange(out_size)
    starts = (i * in_size) // out_size                      # floor(i * in / out)
    ends = ((i + 1) * in_size + out_size - 1) // out_size   # ceil((i+1) * in / out)
    j = jnp.arange(in_size)
    mask = (j[None, :] >= starts[:, None]) & (j[None, :] < ends[:, None])
    counts = (ends - starts).astype(jnp.float32)
    return mask.astype(jnp.float32) / counts[:, None]


def _round_up(x: int, m: int) -> int:
    return ((x + m - 1) // m) * m


def _make_kernel(n_b: int, h: int, horizontal: bool):
    """Kernel processing n_b images per grid step with two matmul stages."""

    def kernel(x_ref, a_ref, b_ref, bias_ref, o_ref):
        # x_ref:    (n_b*h, W)          flattened image block (compute dtype)
        # a_ref:    (W, K1)             stage-1 matrix: pw.T (horizontal) or fused
        #                               (weight@pw).T padded to 128 (vertical)
        # b_ref:    (h, 128) | (T, h)   stage-2 matrix: fused (weight@ph).T padded
        #                               (horizontal) or ph (vertical)
        # bias_ref: (1, 128)            f32 bias, zero-padded
        # o_ref:    (n_b, T, 128)       f32 output block
        a = a_ref[...]
        # Stage 1: one big MXU matmul over the whole image block (contracts W).
        s1 = jnp.dot(x_ref[...], a, preferred_element_type=jnp.float32)  # (n_b*h, K1)
        b = b_ref[...]
        s1 = s1.astype(b.dtype)
        bias = bias_ref[...]
        # Stage 2: small per-image matmul (contracts H) + lane-dense (128-wide) store.
        # n_b is capped (<= batch_block), so this static unroll stays small.
        for i in range(n_b):
            si = s1[i * h:(i + 1) * h, :]                     # (h, K1) static slice
            if horizontal:
                # out[t, l] = sum_h si[h, t] * b[h, l]
                out_i = jax.lax.dot_general(
                    si, b, (((0,), (0,)), ((), ())),
                    preferred_element_type=jnp.float32)       # (T, 128)
            else:
                # out[t, l] = sum_h b[t, h] * si[h, l]
                out_i = jnp.dot(b, si,
                                preferred_element_type=jnp.float32)  # (T, 128)
            o_ref[i] = out_i + bias

    return kernel


def dummy_model_forward(x_nchw, weight, bias, adaptive_size, horizontal=True,
                        *, compute_dtype=jnp.float32, batch_block=16):
    """DummyModel.forward. Returns (seq (T,N,L), packed_data (T*N,L), lengths (N,))."""
    n, c, h, w = x_nchw.shape
    assert c == 1, "DummyModel's Linear sizing implies single-channel images"
    x = x_nchw[:, 0].astype(compute_dtype)                    # (N, H, W)
    h_out, w_out = adaptive_size
    num_labels = weight.shape[0]
    l_pad = _round_up(max(num_labels, 1), _LANE)

    ph = _adaptive_pool_matrix(h, h_out)                      # (h_out, H)
    pw = _adaptive_pool_matrix(w, w_out)                      # (w_out, W)
    w_f32 = weight.astype(jnp.float32)

    # Pad H to a multiple of 8 so the (N, H, W) -> (N*H, W) flatten is layout-trivial.
    # Matching zero rows/columns in the stage-2 matrix keep the numerics exact.
    h_pad = _round_up(h, 8)
    if h_pad != h:
        x = jnp.pad(x, ((0, 0), (0, h_pad - h), (0, 0)))

    if horizontal:
        t = w_out                                             # sequence over columns
        m = (w_f32 @ ph).T                                    # fused Linear+H-pool: (H, L)
        m = jnp.pad(m, ((0, h_pad - h), (0, l_pad - num_labels)))
        a_mat = pw.T                                          # (W, T)      stage 1
        b_mat = m                                             # (H_pad, Lp) stage 2
    else:
        t = h_out                                             # sequence over rows
        mw = (w_f32 @ pw).T                                   # fused Linear+W-pool: (W, L)
        a_mat = jnp.pad(mw, ((0, 0), (0, l_pad - num_labels)))  # (W, Lp)   stage 1
        b_mat = jnp.pad(ph, ((0, 0), (0, h_pad - h)))         # (T, H_pad)  stage 2
    a_mat = a_mat.astype(compute_dtype)
    b_mat = b_mat.astype(compute_dtype)
    bias_p = jnp.pad(bias.astype(jnp.float32),
                     (0, l_pad - num_labels)).reshape(1, l_pad)

    # Images per grid step: amortize per-step overhead while keeping the
    # double-buffered input block comfortably inside scoped VMEM on v5e/v6e/v7x.
    bytes_per_img = h_pad * w * jnp.dtype(compute_dtype).itemsize
    n_b = max(1, min(n, batch_block, (4 * 1024 * 1024) // max(bytes_per_img, 1)))
    grid = (pl.cdiv(n, n_b),)

    x_flat = x.reshape(n * h_pad, w)                          # free view on host

    out = pl.pallas_call(
        _make_kernel(n_b, h_pad, horizontal),
        out_shape=jax.ShapeDtypeStruct((n, t, l_pad), jnp.float32),
        grid=grid,
        in_specs=[
            pl.BlockSpec((n_b * h_pad, w), lambda i: (i, 0)),
            pl.BlockSpec(a_mat.shape, lambda i: (0, 0)),      # resident across the grid
            pl.BlockSpec(b_mat.shape, lambda i: (0, 0)),
            pl.BlockSpec((1, l_pad), lambda i: (0, 0)),
        ],
        out_specs=pl.BlockSpec((n_b, t, l_pad), lambda i: (i, 0, 0)),
        compiler_params=pltpu.CompilerParams(
            dimension_semantics=("parallel",),                # megacore split on v7x
            vmem_limit_bytes=32 * 1024 * 1024,
        ),
    )(x_flat, a_mat, b_mat, bias_p)                           # (N, T, Lp) f32

    out = out[..., :num_labels]                               # (N, T, L)
    seq = jnp.transpose(out, (1, 0, 2))                       # (T, N, L), batch_first=False
    packed_data = seq.reshape(-1, num_labels)                 # time-major flatten (equal lens)
    lengths = jnp.full((n,), t, dtype=jnp.int32)
    return seq, packed_data, lengths


def _reference(x_nchw, weight, bias, adaptive_size, horizontal):
    """Pure-JAX f32 reference for DummyModel.forward (sequence output, (T, N, L))."""
    x0 = x_nchw[:, 0].astype(jnp.float32)
    h, w = x0.shape[1:]
    h_out, w_out = adaptive_size
    ph = _adaptive_pool_matrix(h, h_out)
    pw = _adaptive_pool_matrix(w, w_out)
    pooled = jnp.einsum("oh,nhw,pw->nop", ph, x0, pw)         # (N, h_out, w_out)
    if horizontal:
        seq = jnp.transpose(pooled, (2, 0, 1))                # (w_out, N, h_out)
    else:
        seq = jnp.transpose(pooled, (1, 0, 2))                # (h_out, N, w_out)
    return jnp.einsum("tnf,lf->tnl", seq, weight.astype(jnp.float32)) + bias


if __name__ == "__main__":
    root = jax.random.PRNGKey(0)

    def run_case(case_id, n, h, w, adaptive_size, num_labels, horizontal,
                 compute_dtype, atol):
        kx, kw, kb = jax.random.split(jax.random.fold_in(root, case_id), 3)
        feat_in = adaptive_size[0] if horizontal else adaptive_size[1]
        x = jax.random.normal(kx, (n, 1, h, w), dtype=jnp.float32)
        weight = 0.1 * jax.random.normal(kw, (num_labels, feat_in), dtype=jnp.float32)
        bias = 0.1 * jax.random.normal(kb, (num_labels,), dtype=jnp.float32)

        seq, packed, lengths = dummy_model_forward(
            x, weight, bias, adaptive_size, horizontal, compute_dtype=compute_dtype)
        jax.block_until_ready((seq, packed, lengths))

        t = adaptive_size[1] if horizontal else adaptive_size[0]
        ref = _reference(x, weight, bias, adaptive_size, horizontal)
        assert seq.shape == (t, n, num_labels), (seq.shape, (t, n, num_labels))
        assert packed.shape == (t * n, num_labels)
        assert bool(jnp.all(lengths == t))
        assert jnp.allclose(seq, ref, atol=atol, rtol=atol), (
            f"case {case_id}: max abs err {jnp.max(jnp.abs(seq - ref))}")
        assert jnp.allclose(packed, ref.reshape(-1, num_labels), atol=atol, rtol=atol)

    # Small shapes consistent with the module (C == 1 grayscale HTR images).
    run_case(0, n=2, h=16, w=16, adaptive_size=(8, 8), num_labels=5,
             horizontal=True, compute_dtype=jnp.float32, atol=1e-5)
    run_case(1, n=3, h=16, w=24, adaptive_size=(8, 10), num_labels=5,
             horizontal=False, compute_dtype=jnp.float32, atol=1e-5)
    run_case(2, n=2, h=16, w=16, adaptive_size=(8, 8), num_labels=5,
             horizontal=True, compute_dtype=jnp.bfloat16, atol=3e-2)

    print("KERNEL_OK")
</pallas_src>

<mosaic_0001>
module attributes {stable_mosaic.version = 11 : i64} {
  func.func @kernel(%arg0: i32, %arg1: memref<32x16xf32, #tpu.memory_space<vmem>>, %arg2: memref<16x8xf32, #tpu.memory_space<vmem>>, %arg3: memref<16x128xf32, #tpu.memory_space<vmem>>, %arg4: memref<1x128xf32, #tpu.memory_space<vmem>>, %arg5: memref<2x8x128xf32, #tpu.memory_space<vmem>>) attributes {dimension_semantics = [#tpu.dimension_semantics<parallel>], iteration_bounds = array<i64: 1>, scalar_prefetch = 0 : i64, scratch_operands = 0 : i64, tpu.core_type = #tpu.core_type<tc>, window_params = [{transform_indices = @transform_0, window_bounds = array<i64: 32, 16>}, {pipeline_mode = #tpu.pipeline_mode<synchronous>, transform_indices = @transform_1, window_bounds = array<i64: 16, 8>}, {pipeline_mode = #tpu.pipeline_mode<synchronous>, transform_indices = @transform_2, window_bounds = array<i64: 16, 128>}, {pipeline_mode = #tpu.pipeline_mode<synchronous>, transform_indices = @transform_3, window_bounds = array<i64: 1, 128>}, {transform_indices = @transform_4, window_bounds = array<i64: 2, 8, 128>}]} {
    %c0 = arith.constant 0 : index
    %c0_0 = arith.constant 0 : index
    %0 = vector.load %arg2[%c0, %c0_0] : memref<16x8xf32, #tpu.memory_space<vmem>>, vector<16x8xf32>
    %c0_1 = arith.constant 0 : index
    %c0_2 = arith.constant 0 : index
    %1 = vector.load %arg1[%c0_1, %c0_2] : memref<32x16xf32, #tpu.memory_space<vmem>>, vector<32x16xf32>
    %cst = arith.constant dense<0.000000e+00> : vector<32x8xf32>
    %2 = tpu.matmul %1, %0, %cst {dimension_numbers = #tpu.dot_dimension_numbers<[1], [0], [0], [1], [0, 0, 1, 1], [], []>} : vector<32x16xf32>, vector<16x8xf32>, vector<32x8xf32> -> vector<32x8xf32>
    %c0_3 = arith.constant 0 : index
    %c0_4 = arith.constant 0 : index
    %3 = vector.load %arg3[%c0_3, %c0_4] : memref<16x128xf32, #tpu.memory_space<vmem>>, vector<16x128xf32>
    %c0_5 = arith.constant 0 : index
    %c0_6 = arith.constant 0 : index
    %4 = vector.load %arg4[%c0_5, %c0_6] : memref<1x128xf32, #tpu.memory_space<vmem>>, vector<1x128xf32>
    %5 = vector.extract_strided_slice %2 {offsets = [0, 0], sizes = [16, 8], strides = [1, 1]} : vector<32x8xf32> to vector<16x8xf32>
    %cst_7 = arith.constant dense<0.000000e+00> : vector<8x128xf32>
    %6 = tpu.matmul %5, %3, %cst_7 {dimension_numbers = #tpu.dot_dimension_numbers<[0], [0], [1], [1], [0, 1, 1, 1], [], []>} : vector<16x8xf32>, vector<16x128xf32>, vector<8x128xf32> -> vector<8x128xf32>
    %7 = vector.broadcast %4 : vector<1x128xf32> to vector<8x128xf32>
    %8 = arith.addf %6, %7 : vector<8x128xf32>
    %c0_8 = arith.constant 0 : index
    %c0_9 = arith.constant 0 : index
    %c0_10 = arith.constant 0 : index
    %9 = vector.load %arg5[%c0_8, %c0_9, %c0_10] : memref<2x8x128xf32, #tpu.memory_space<vmem>>, vector<1x8x128xf32>
    %10 = vector.shape_cast %9 : vector<1x8x128xf32> to vector<8x128xf32>
    %11 = vector.shape_cast %8 : vector<8x128xf32> to vector<1x8x128xf32>
    tpu.vector_store %arg5[%c0_8, %c0_9, %c0_10], %11 {strides = array<i32>} : memref<2x8x128xf32, #tpu.memory_space<vmem>>, vector<1x8x128xf32>,
    %12 = vector.extract_strided_slice %2 {offsets = [16, 0], sizes = [16, 8], strides = [1, 1]} : vector<32x8xf32> to vector<16x8xf32>
    %cst_11 = arith.constant dense<0.000000e+00> : vector<8x128xf32>
    %13 = tpu.matmul %12, %3, %cst_11 {dimension_numbers = #tpu.dot_dimension_numbers<[0], [0], [1], [1], [0, 1, 1, 1], [], []>} : vector<16x8xf32>, vector<16x128xf32>, vector<8x128xf32> -> vector<8x128xf32>
    %14 = vector.broadcast %4 : vector<1x128xf32> to vector<8x128xf32>
    %15 = arith.addf %13, %14 : vector<8x128xf32>
    %c1 = arith.constant 1 : index
    %c0_12 = arith.constant 0 : index
    %c0_13 = arith.constant 0 : index
    %16 = vector.load %arg5[%c1, %c0_12, %c0_13] : memref<2x8x128xf32, #tpu.memory_space<vmem>>, vector<1x8x128xf32>
    %17 = vector.shape_cast %16 : vector<1x8x128xf32> to vector<8x128xf32>
    %18 = vector.shape_cast %15 : vector<8x128xf32> to vector<1x8x128xf32>
    tpu.vector_store %arg5[%c1, %c0_12, %c0_13], %18 {strides = array<i32>} : memref<2x8x128xf32, #tpu.memory_space<vmem>>, vector<1x8x128xf32>,
    return
  }
  func.func @transform_0(%arg0: i32) -> (i32, i32) {
    %c0_i32 = arith.constant 0 : i32
    %c0_i32_0 = arith.constant 0 : i32
    return %arg0, %c0_i32 : i32, i32
  }
  func.func @transform_1(%arg0: i32) -> (i32, i32) {
    %c0_i32 = arith.constant 0 : i32
    %c0_i32_0 = arith.constant 0 : i32
    %c0_i32_1 = arith.constant 0 : i32
    return %c0_i32, %c0_i32_0 : i32, i32
  }
  func.func @transform_2(%arg0: i32) -> (i32, i32) {
    %c0_i32 = arith.constant 0 : i32
    %c0_i32_0 = arith.constant 0 : i32
    %c0_i32_1 = arith.constant 0 : i32
    return %c0_i32, %c0_i32_0 : i32, i32
  }
  func.func @transform_3(%arg0: i32) -> (i32, i32) {
    %c0_i32 = arith.constant 0 : i32
    %c0_i32_0 = arith.constant 0 : i32
    %c0_i32_1 = arith.constant 0 : i32
    return %c0_i32, %c0_i32_0 : i32, i32
  }
  func.func @transform_4(%arg0: i32) -> (i32, i32, i32) {
    %c0_i32 = arith.constant 0 : i32
    %c0_i32_0 = arith.constant 0 : i32
    %c0_i32_1 = arith.constant 0 : i32
    return %arg0, %c0_i32, %c0_i32_0 : i32, i32, i32
  }
}

</mosaic_0001>

<bundles_post_ra>
// kernel: tpu_custom_call.1
= control target key start
LH: loop header
LB: loop body
LE: loop exit
PB: predicated region body
PF: predicated region fallthrough
CT: control target
= control target key end

     0   :  { %vm24_vm0 = vcmask 130048   ;;  %s521_s0 = inlined_call_operand.vmem [shape: f32[32,16], index: 0, kind: input, shape index: {}]   ;;  %s522_s1 = inlined_call_operand.vmem [shape: f32[16,8], index: 1, kind: input, shape index: {}]   ;;  %s523_s2 = inlined_call_operand.vmem [shape: f32[16,128], index: 2, kind: input, shape index: {}]   ;;  %s524_s3 = inlined_call_operand.vmem [shape: f32[1,128], index: 3, kind: input, shape index: {}]   ;;  %s525_s4 = inlined_call_operand.hbm [shape: f32[2,8,128], index: 4, kind: output, shape index: {}]  }
   0x1   :  { %v18_v0 = vld [vmem:[%s522_s1] sm:$0xff]  ;;  %v19_v1 = vld [vmem:[%s522_s1 + $0x8] sm:$0xff] }
   0x2   :  { %v20_v2 = vld [vmem:[%s521_s0] sm:$0xff]  ;;  %v403_v3 = vpack.c.bf16 %v19_v1, %v18_v0 }
   0x3   :  { %383 = vmatprep.mubr.msk.f32.mxu0 %vm24_vm0, %v20_v2 }
   0x4   :  { %9 = vsyncpa [#allocation3], 0  ;;  %404 = vmatprep.subr.bf16.mxu0 %v403_v3  ;;  %v21_v4 = vld [vmem:[%s521_s0 + $0x8] sm:$0xff]  ;;  %v22_v5 = vld [vmem:[%s521_s0 + $0x10] sm:$0xff]  ;;  %v443_v9 = vmov 0.0|0.0   ;;  %vm444_vm1 = vmmov 0  }
   0x5   :  { %406 = vmatpush3.bf16.msra.mxu0 %v403_v3  ;;  %v23_v6 = vld [vmem:[%s521_s0 + $0x18] sm:$0xff]  ;;  %v122_v7 = vld [vmem:[%s523_s2] sm:$0xff]  ;;  %v123_v8 = vld [vmem:[%s523_s2 + $0x8] sm:$0xff]  ;;  %407 = vmatprep.subr.bf16.mxu1 %v443_v9  ;;  %v445_v11 = vmov 0.0   ;;  %s446_s30 = smov [#allocation2]  }
   0x6   :  { %v408_v10 = vpack.c.bf16 %v123_v8, %v122_v7  ;;  %393 = vmatprep.mubr.msk.f32.mxu1 %vm444_vm1, %v445_v11  ;;  %v364_v18 = vld [vmem:[%s524_s3] ss:$0 sm:$0xff]  ;;  %s349_s5 = sshll.u32 %s446_s30, 4  ;;  %s350_s5 = int_to_ptr.vmem [resolvable:$true] %s349_s5 }
   0x7   :  { %s419_s6 = scalar_lea.vmem %s350_s5, 256  ;;  %p424_p1 = scmp.lt.s32.totalorder %s350_s5, %s350_s5 }
   0x8   :  { %384 = vmatmul.mubr.msk.f32.vlgmr.msra.gmra.mrb[0].mxu0 %vm24_vm0, %v21_v4  ;;  %409 = vmatpush3.bf16.msra.mxu1 %v408_v10  ;;  %p420_p0 = scmp.ne.s32.totalorder %s350_s5, %s419_s6  ;;  %p425_p2 = scmp.lt.s32.totalorder %s419_s6, %s419_s6 }
   0x9   :  { %386 = vmatprep.mubr.msk.f32.mxu0 %vm24_vm0, %v22_v5  ;;  %410 = vmatprep.subr.bf16.mxu1 %v443_v9 }
   0xa   :  { %p426_p3 = por %p425_p2, %p424_p1 }
   0xc   :  { %387 = vmatmul.mubr.msk.f32.gmra.mrb[2].mxu0 %vm24_vm0, %v23_v6  ;;  %p427_p4 = pnand %p426_p3, %p420_p0 }
  0xdb   :  { %v385_v12 = vpop.f32.mrb[0].mxu0 }
  0xdc   :  { %v103_v13 = vpop.f32.mrb[1].mxu0 }
  0xdd   :  { %131 = vxpose.xlu0.b32.start [1/2] (short) (narrow) %v103_v13, 8 }
  0xdf   :  { %v388_v14 = vpop.f32.mrb[2].mxu0 }
  0xe0   :  { %v113_v15 = vpop.f32.mrb[3].mxu0 }
  0xe1   :  { %132 = vxpose.xlu0.b32.end [2/2] (short) (narrow) %v385_v12, 8  ;;  %237 = vxpose.xlu1.b32.start [1/2] (short) (narrow) %v113_v15, 8 }
  0xe5   :  { %238 = vxpose.xlu1.b32.end [2/2] (short) (narrow) %v388_v14, 8 }
 0x15d   :  { %v147_v16 = vpop.trf.xlu0 }
 0x15e   :  { %394 = vmatmul.mubr.msk.f32.vlgmr.msra.gmra.mrb[0].mxu1 %vm24_vm0, %v147_v16 }
 0x15f   :  { %412 = vmatpush3.bf16.msra.mxu1 %v408_v10  ;;  %400 = vmatprep.mubr.msk.f32.mxu1 %vm444_vm1, %v445_v11 }
 0x161   :  { %v253_v17 = vpop.trf.xlu1 }
 0x162   :  { %401 = vmatmul.mubr.msk.f32.vlgmr.msra.gmra.mrb[2].mxu1 %vm24_vm0, %v253_v17 }
 0x231   :  { %v232_v19 = vpop.f32.mrb[0].mxu1 }
 0x232   :  { %v233_v20 = vadd.f32 %v364_v18, %v232_v19  ;;  %v395_v21 = vpop.f32.mrb[1].mxu1 }
 0x234   :  { %236 = vst [vmem:[#allocation2] sm:$0xff] %v233_v20 }
 0x235   :  { %v338_v22 = vpop.f32.mrb[2].mxu1 }
 0x236   :  { %v339_v23 = vadd.f32 %v364_v18, %v338_v22  ;;  %v402_v24 = vpop.f32.mrb[3].mxu1 }
 0x238   :  { %343 = vst [vmem:[#allocation2 + $0x8] sm:$0xff] %v339_v23 }
 0x239   :  { %430 = shalt.err (!%p427_p4)
}
 0x23a   :  { %s431_s8 = scalar_lea.hbm %s525_s4, 256 }
 0x23b   :  { %p432_p5 = scmp.ne.s32.totalorder %s525_s4, %s431_s8  ;;  %p435_p6 = scmp.lt.u32.totalorder %s431_s8, %s525_s4 }
 0x23d   :  { %p437_p7 = pnand %p435_p6, %p432_p5 }
 0x23f   :  { %440 = shalt.err (!%p437_p7)
}
 0x240   :  { %s447_s13 = smov 128   ;;  %s448_s14 = smov 8  }
 0x241   :  { %355 = dma.vmem_to_hbm [thread:$0]  %s350_s5, 256, %s525_s4, [#allocation3], %s447_s13, %s447_s13, %s448_s14  }
 0x242   :  { %441 = dma.done.wait [#allocation3], 256  }
 0x243   :  { %442 = vsyncadd [#allocation3], 4294967040 }
 0x244   :  { %359 = vsyncpa [#allocation3], 1 }

</bundles_post_ra>
